<compile_context>
chip_gen: v7x
topology: tpu7x:2x2x1
jax: 0.10.0
libtpu: 0.0.40
codegen_flags: <defaults>
</compile_context>

<pallas_src>
import numpy as np
import jax
import jax.numpy as jnp
from jax import lax
from jax.experimental import pallas as pl
from jax.experimental.pallas import tpu as pltpu

N_ITERS = 50                       # nn.Module default n_iters=50
TARGET_BLOCK_BYTES = 2 * 1024 * 1024   # ~2 MiB (f32-equivalent) per pipelined buffer
MIN_GRID_STEPS = 4                 # keep both v7x TCs busy + prefetch overlap
ROW_QUANTUM = 16                   # sublane multiple valid for f32 and bf16 blocks
CHUNK_R = 16                       # register-resident chunk rows (non-uniform path)
MAX_NONUNIFORM_TILE_R = 256        # bounds unrolled chunk count in the VALU-bound path


def _cdiv(a, b):
    return -(-a // b)


def _round_up(a, m):
    return _cdiv(a, m) * m


def _pow_int(base, n):
    """base**n with ~log2(n) multiplies (binary exponentiation, static n >= 1)."""
    result = None
    while n > 0:
        if n & 1:
            result = base if result is None else result * base
        n >>= 1
        if n:
            base = base * base
    return result


def make_uniform_kernel(ss, n_iters):
    """All stepsizes equal: fwd_n = tgt + (1 - ss*w)**n * (x - tgt).

    HBM-bandwidth bound (~7 VPU muls/element); whole-block compute, no inner
    loop.  Note: the closed form reassociates n f32 multiplies; fine at 1e-4
    tolerance in the contractive regime |1 - ss*w| <= 1 (the sequential loop
    itself diverges otherwise).
    """
    ss = np.float32(ss)
    n_iters = int(n_iters)

    def kernel(x_ref, w_ref, t_ref, o_ref):
        x = x_ref[...].astype(jnp.float32)
        t = t_ref[...].astype(jnp.float32)
        c = 1.0 - ss * w_ref[...].astype(jnp.float32)
        coeff = _pow_int(c, n_iters)
        o_ref[...] = (t + coeff * (x - t)).astype(o_ref.dtype)

    return kernel


def make_nonuniform_kernel(stepsizes):
    """General (compile-time constant) stepsizes.

    fwd_n = tgt + coeff * (x - tgt) with coeff = prod_i (1 - ss_i * w).
    Consecutive steps are paired algebraically:
        (1 - a*w)(1 - b*w) = 1 - (a+b)*w + (a*b)*w2,  w2 = w*w precomputed,
    ~2.5 VPU ops / element / step instead of 3.  Chunked over rows so the
    working set stays register resident (this path is VALU-bound on v6e/v7x).
    """
    ss = [float(s) for s in np.asarray(stepsizes, dtype=np.float64)]
    pairs = [(ss[i], ss[i + 1]) for i in range(0, len(ss) - 1, 2)]
    tail = ss[-1] if (len(ss) % 2 == 1) else None

    def coeff_of(w):
        coeff = None
        if pairs:
            w2 = w * w
            for a, b in pairs:
                f = 1.0 - np.float32(a + b) * w + np.float32(a * b) * w2
                coeff = f if coeff is None else coeff * f
        if tail is not None:
            f = 1.0 - np.float32(tail) * w
            coeff = f if coeff is None else coeff * f
        return coeff

    def kernel(x_ref, w_ref, t_ref, o_ref):
        rows = x_ref.shape[0]

        def do(sl):
            x = x_ref[sl].astype(jnp.float32)
            w = w_ref[sl].astype(jnp.float32)
            t = t_ref[sl].astype(jnp.float32)
            o_ref[sl] = (t + coeff_of(w) * (x - t)).astype(o_ref.dtype)

        if rows > CHUNK_R and rows % CHUNK_R == 0:
            n_chunks = rows // CHUNK_R

            def chunk(ci, carry):
                r0 = pl.multiple_of(ci * CHUNK_R, CHUNK_R)
                do((pl.ds(r0, CHUNK_R), slice(None)))
                return carry

            lax.fori_loop(0, n_chunks, chunk, 0, unroll=True)
        else:
            do((slice(None), slice(None)))

    return kernel


def adhoc_weighted_l2_forward(x, param_weights, target, stepsize):
    """Pallas-TPU AdHocWeightedL2.forward with gradFun(fwd) = fwd - target."""
    orig_shape, orig_dtype = x.shape, x.dtype

    # Stepsizes are module buffers (0.01 * ones by default) -> bake in as
    # compile-time constants.
    # TODO(synk): a traced stepsize (e.g. differentiating w.r.t. stepsize) would
    # need an SMEM scalar-prefetch path; the original forward runs under no_grad.
    try:
        ss_host = np.asarray(stepsize, dtype=np.float64)
    except Exception as e:
        raise ValueError("stepsize must be a concrete array, not a JAX tracer") from e
    n_iters = int(ss_host.shape[0])
    if n_iters == 0:
        return x

    # Broadcast / dtype-align the elementwise operands (no-op in the common case).
    if param_weights.shape != orig_shape:
        param_weights = jnp.broadcast_to(param_weights, orig_shape)
    if target.shape != orig_shape:
        target = jnp.broadcast_to(target, orig_shape)
    if param_weights.dtype != orig_dtype:
        param_weights = param_weights.astype(orig_dtype)
    if target.dtype != orig_dtype:
        target = target.astype(orig_dtype)

    uniform = bool(np.all(ss_host == ss_host[0]))
    kernel = (make_uniform_kernel(ss_host[0], n_iters) if uniform
              else make_nonuniform_kernel(ss_host))

    # Lane-dense (R, C) 2-D view of the (contiguous) data.  Reshapes of
    # contiguous arrays are layout-free; only the ragged case pays one pad copy.
    n = int(np.prod(orig_shape)) if len(orig_shape) else 1
    last = orig_shape[-1] if len(orig_shape) >= 1 else 1
    padded = False
    if len(orig_shape) >= 2 and last % 128 == 0 and last <= 4096:
        R, C = n // last, last
    elif n % 512 == 0:
        R, C = n // 512, 512
    elif n % 256 == 0:
        R, C = n // 256, 256
    elif n % 128 == 0:
        R, C = n // 128, 128
    else:
        C = 128                      # ragged tail: one pad copy per operand
        R = _cdiv(n, C)
        padded = True
    n_pad = R * C

    def view2d(a):
        flat = jnp.ravel(a)
        if padded:
            flat = jnp.pad(flat, (0, n_pad - n))
        return flat.reshape(R, C)

    x2, w2, t2 = view2d(x), view2d(param_weights), view2d(target)

    # Row tiling: ~2 MiB f32-equivalent blocks, >= MIN_GRID_STEPS grid steps when
    # the problem is large enough, rows a multiple of 16 (f32/bf16-safe tiling).
    if R <= ROW_QUANTUM:
        tile_r = R                   # block equals full row extent (always legal)
    else:
        by_vmem = max(ROW_QUANTUM,
                      (TARGET_BLOCK_BYTES // (C * 4)) // ROW_QUANTUM * ROW_QUANTUM)
        by_grid = _round_up(max(1, _cdiv(R, MIN_GRID_STEPS)), ROW_QUANTUM)
        tile_r = min(by_vmem, by_grid, _round_up(R, ROW_QUANTUM))
        if not uniform:
            tile_r = min(tile_r, MAX_NONUNIFORM_TILE_R)

    grid = (_cdiv(R, tile_r),)       # last block may be partial; Pallas masks it
    spec = pl.BlockSpec((tile_r, C), lambda i: (i, 0))

    out = pl.pallas_call(
        kernel,
        out_shape=jax.ShapeDtypeStruct((R, C), orig_dtype),
        grid=grid,
        in_specs=[spec, spec, spec],
        out_specs=spec,
        compiler_params=pltpu.CompilerParams(
            dimension_semantics=("parallel",),     # megacore-shardable on v7x
            vmem_limit_bytes=32 * 1024 * 1024,     # fits v5e/v6e/v7x scoped VMEM
        ),
    )(x2, w2, t2)

    if padded:
        out = jnp.ravel(out)[:n]
    return out.reshape(orig_shape)


def reference_forward(x, param_weights, target, stepsize):
    """Pure-JAX (f32) mirror of AdHocWeightedL2.forward with gradFun = fwd - target."""
    fwd = x
    for i in range(stepsize.shape[0]):
        fwd = fwd - stepsize[i] * (param_weights * (fwd - target))
    return fwd


def reference_forward_f64(x, param_weights, target, stepsize):
    """float64 numpy ground truth of the same loop."""
    fwd = np.asarray(x, np.float64)
    w = np.asarray(param_weights, np.float64)
    tgt = np.asarray(target, np.float64)
    for s in np.asarray(stepsize, np.float64):
        fwd = fwd - s * (w * (fwd - tgt))
    return fwd


if __name__ == "__main__":
    key = jax.random.PRNGKey(0)
    k_w, k_x, k_t = jax.random.split(key, 3)

    # Module constructor arguments (small, deterministic).
    num_inits = 2
    size_array = [(8, 16), (4, 32)]                       # per-group flattened views
    D = sum(int(np.prod(s)) for s in size_array)          # 256 total params / init

    # __init__: stepsize = 0.01 * ones(n_iters)  (uniform -> closed-form path).
    stepsize = 0.01 * np.ones((N_ITERS,), np.float32)

    # TODO(synk): self.param_weights is never defined in __init__ (set externally
    # in the original codebase); synthesize deterministic positive weights.
    param_weights = 0.5 + jax.random.uniform(k_w, (num_inits, D), jnp.float32)

    # Forward inputs: flattened per-init parameter vector and the L2 target that
    # defines gradFun(fwd) = fwd - target.
    x = jax.random.normal(k_x, (num_inits, D), jnp.float32)
    target = jax.random.normal(k_t, (num_inits, D), jnp.float32)

    fwd_jit = jax.jit(
        lambda xx, ww, tt: adhoc_weighted_l2_forward(xx, ww, tt, stepsize))
    out = jax.block_until_ready(fwd_jit(x, param_weights, target))

    assert out.shape == (num_inits, D) and out.dtype == jnp.float32

    # The closed form reassociates 50 f32 multiplies; verify at 1e-4 against both
    # the float64 ground truth and the sequential f32 loop.
    ref64 = reference_forward_f64(x, param_weights, target, stepsize)
    ref32 = reference_forward(x, param_weights, target, jnp.asarray(stepsize))
    assert np.allclose(np.asarray(out, np.float64), ref64, atol=1e-4, rtol=1e-4)
    assert jnp.allclose(out, ref32, atol=1e-4, rtol=1e-4)

    # Also exercise the non-uniform stepsize fallback (paired coefficient-product).
    stepsize_var = np.linspace(0.005, 0.02, N_ITERS, dtype=np.float32)
    fwd_var_jit = jax.jit(
        lambda xx, ww, tt: adhoc_weighted_l2_forward(xx, ww, tt, stepsize_var))
    out_var = jax.block_until_ready(fwd_var_jit(x, param_weights, target))
    ref_var = reference_forward(x, param_weights, target, jnp.asarray(stepsize_var))
    assert jnp.allclose(out_var, ref_var, atol=1e-4, rtol=1e-4)

    print("KERNEL_OK")
</pallas_src>

<mosaic_0001>
module attributes {stable_mosaic.version = 11 : i64} {
  func.func @kernel(%arg0: i32, %arg1: memref<2x256xf32, #tpu.memory_space<vmem>>, %arg2: memref<2x256xf32, #tpu.memory_space<vmem>>, %arg3: memref<2x256xf32, #tpu.memory_space<vmem>>, %arg4: memref<2x256xf32, #tpu.memory_space<vmem>>) attributes {dimension_semantics = [#tpu.dimension_semantics<parallel>], iteration_bounds = array<i64: 1>, scalar_prefetch = 0 : i64, scratch_operands = 0 : i64, tpu.core_type = #tpu.core_type<tc>, window_params = [{transform_indices = @transform_0, window_bounds = array<i64: 2, 256>}, {transform_indices = @transform_1, window_bounds = array<i64: 2, 256>}, {transform_indices = @transform_2, window_bounds = array<i64: 2, 256>}, {transform_indices = @transform_3, window_bounds = array<i64: 2, 256>}]} {
    %c0 = arith.constant 0 : index
    %c0_0 = arith.constant 0 : index
    %0 = vector.load %arg1[%c0, %c0_0] : memref<2x256xf32, #tpu.memory_space<vmem>>, vector<2x256xf32>
    %c0_1 = arith.constant 0 : index
    %c0_2 = arith.constant 0 : index
    %1 = vector.load %arg3[%c0_1, %c0_2] : memref<2x256xf32, #tpu.memory_space<vmem>>, vector<2x256xf32>
    %c0_3 = arith.constant 0 : index
    %c0_4 = arith.constant 0 : index
    %2 = vector.load %arg2[%c0_3, %c0_4] : memref<2x256xf32, #tpu.memory_space<vmem>>, vector<2x256xf32>
    %cst = arith.constant 0.00999999977 : f32
    %3 = vector.broadcast %cst : f32 to vector<2x256xf32>
    %4 = arith.mulf %3, %2 : vector<2x256xf32>
    %cst_5 = arith.constant 1.000000e+00 : f32
    %5 = vector.broadcast %cst_5 : f32 to vector<2x256xf32>
    %6 = arith.subf %5, %4 : vector<2x256xf32>
    %7 = arith.mulf %6, %6 : vector<2x256xf32>
    %8 = arith.mulf %7, %7 : vector<2x256xf32>
    %9 = arith.mulf %8, %8 : vector<2x256xf32>
    %10 = arith.mulf %9, %9 : vector<2x256xf32>
    %11 = arith.mulf %7, %10 : vector<2x256xf32>
    %12 = arith.mulf %10, %10 : vector<2x256xf32>
    %13 = arith.mulf %11, %12 : vector<2x256xf32>
    %14 = arith.subf %0, %1 : vector<2x256xf32>
    %15 = arith.mulf %13, %14 : vector<2x256xf32>
    %16 = arith.addf %1, %15 : vector<2x256xf32>
    %c0_6 = arith.constant 0 : index
    %c0_7 = arith.constant 0 : index
    %17 = vector.load %arg4[%c0_6, %c0_7] : memref<2x256xf32, #tpu.memory_space<vmem>>, vector<2x256xf32>
    tpu.vector_store %arg4[%c0_6, %c0_7], %16 {strides = array<i32>} : memref<2x256xf32, #tpu.memory_space<vmem>>, vector<2x256xf32>,
    return
  }
  func.func @transform_0(%arg0: i32) -> (i32, i32) {
    %c0_i32 = arith.constant 0 : i32
    %c0_i32_0 = arith.constant 0 : i32
    return %arg0, %c0_i32 : i32, i32
  }
  func.func @transform_1(%arg0: i32) -> (i32, i32) {
    %c0_i32 = arith.constant 0 : i32
    %c0_i32_0 = arith.constant 0 : i32
    return %arg0, %c0_i32 : i32, i32
  }
  func.func @transform_2(%arg0: i32) -> (i32, i32) {
    %c0_i32 = arith.constant 0 : i32
    %c0_i32_0 = arith.constant 0 : i32
    return %arg0, %c0_i32 : i32, i32
  }
  func.func @transform_3(%arg0: i32) -> (i32, i32) {
    %c0_i32 = arith.constant 0 : i32
    %c0_i32_0 = arith.constant 0 : i32
    return %arg0, %c0_i32 : i32, i32
  }
}

</mosaic_0001>

<bundles_post_ra>
// kernel: _lambda_.1
= control target key start
LH: loop header
LB: loop body
LE: loop exit
PB: predicated region body
PF: predicated region fallthrough
CT: control target
= control target key end

     0   :  { %8 = vsyncpa [#allocation3], 0  ;;  %s208_s0 = inlined_call_operand.hbm [shape: f32[2,256], index: 0, kind: input, shape index: {}]   ;;  %s209_s1 = inlined_call_operand.hbm [shape: f32[2,256], index: 1, kind: input, shape index: {}]   ;;  %s210_s2 = inlined_call_operand.vmem [shape: f32[2,256], index: 2, kind: input, shape index: {}]   ;;  %s211_s3 = inlined_call_operand.hbm [shape: f32[2,256], index: 3, kind: output, shape index: {}]  }
   0x1   :  { %9 = vsyncpa [#allocation6], 0 }
   0x2   :  { %10 = vsyncpa [#allocation4], 0  ;;  %s146_s12 = smov [#allocation2]   ;;  %s147_s14 = smov [#allocation5]  }
   0x3   :  { %s17_s13 = sshll.u32 %s146_s12, 4  ;;  %s27_s15 = sshll.u32 %s147_s14, 4  ;;  %s18_s13 = int_to_ptr.vmem [resolvable:$true] %s17_s13  ;;  %s28_s15 = int_to_ptr.vmem [resolvable:$true] %s27_s15 }
   0x4   :  { %s74_s18 = scalar_lea.hbm %s208_s0, 64 }
   0x5   :  { %p75_p0 = scmp.ne.s32.totalorder %s208_s0, %s74_s18  ;;  %p78_p1 = scmp.lt.u32.totalorder %s74_s18, %s208_s0 }
   0x7   :  { %p80_p2 = pnand %p78_p1, %p75_p0 }
   0x9   :  { %83 = shalt.err (!%p80_p2)
}
   0xa   :  { %s84_s23 = scalar_lea.vmem %s18_s13, 64  ;;  %p89_p4 = scmp.lt.s32.totalorder %s18_s13, %s18_s13 }
   0xb   :  { %p85_p3 = scmp.ne.s32.totalorder %s18_s13, %s84_s23  ;;  %p90_p5 = scmp.lt.s32.totalorder %s84_s23, %s84_s23 }
   0xd   :  { %p91_p6 = por %p90_p5, %p89_p4 }
   0xf   :  { %p92_p7 = pnand %p91_p6, %p85_p3 }
  0x11   :  { %95 = shalt.err (!%p92_p7)
}
  0x12   :  { %20 = dma.hbm_to_vmem [thread:$0]  %s208_s0, 64, %s18_s13, [#allocation3]  }
  0x13   :  { %s96_s28 = scalar_lea.hbm %s209_s1, 64 }
  0x14   :  { %p97_p8 = scmp.ne.s32.totalorder %s209_s1, %s96_s28  ;;  %p100_p9 = scmp.lt.u32.totalorder %s96_s28, %s209_s1 }
  0x16   :  { %p102_p10 = pnand %p100_p9, %p97_p8 }
  0x18   :  { %105 = shalt.err (!%p102_p10)
}
  0x19   :  { %s106_s6 = scalar_lea.vmem %s28_s15, 64  ;;  %p111_p12 = scmp.lt.s32.totalorder %s28_s15, %s28_s15 }
  0x1a   :  { %p107_p11 = scmp.ne.s32.totalorder %s28_s15, %s106_s6  ;;  %p112_p13 = scmp.lt.s32.totalorder %s106_s6, %s106_s6 }
  0x1c   :  { %p113_p0 = por %p112_p13, %p111_p12 }
  0x1e   :  { %p114_p1 = pnand %p113_p0, %p107_p11 }
  0x20   :  { %117 = shalt.err (!%p114_p1)
}
  0x21   :  { %30 = dma.hbm_to_vmem [thread:$0]  %s209_s1, 64, %s28_s15, [#allocation6]  }
  0x22   :  { %140 = dma.done.wait [#allocation3], 64  }
  0x23   :  { %141 = vsyncadd [#allocation3], 4294967232 }
  0x24   :  { %142 = dma.done.wait [#allocation6], 64  }
  0x25   :  { %143 = vsyncadd [#allocation6], 4294967232  ;;  %v41_v0 = vld [vmem:[#allocation5] sm:$0xf]  ;;  %v39_v6 = vld [vmem:[#allocation2] sm:$0xf] }
  0x26   :  { %v42_v1 = vmul.f32 0.01, %v41_v0  ;;  %v40_v7 = vld [vmem:[%s210_s2] sm:$0xf]  ;;  %s148_s1 = smov [#allocation7]  }
  0x27   :  { %v51_v11 = vsub.f32 %v39_v6, %v40_v7  ;;  %s61_s10 = sshll.u32 %s148_s1, 4  ;;  %s62_s10 = int_to_ptr.vmem [resolvable:$true] %s61_s10 }
  0x28   :  { %v43_v2 = vsub.f32 1.0, %v42_v1  ;;  %s118_s11 = scalar_lea.vmem %s62_s10, 64  ;;  %p123_p3 = scmp.lt.s32.totalorder %s62_s10, %s62_s10 }
  0x29   :  { %p119_p2 = scmp.ne.s32.totalorder %s62_s10, %s118_s11  ;;  %p124_p4 = scmp.lt.s32.totalorder %s118_s11, %s118_s11 }
  0x2a   :  { %v44_v3 = vmul.f32 %v43_v2, %v43_v2 }
  0x2b   :  { %p125_p5 = por %p124_p4, %p123_p3 }
  0x2c   :  { %v45_v4 = vmul.f32 %v44_v3, %v44_v3 }
  0x2d   :  { %p126_p6 = pnand %p125_p5, %p119_p2 }
  0x2e   :  { %v46_v5 = vmul.f32 %v45_v4, %v45_v4 }
  0x30   :  { %v47_v8 = vmul.f32 %v46_v5, %v46_v5 }
  0x32   :  { %v48_v9 = vmul.f32 %v47_v8, %v44_v3  ;;  %v49_v10 = vmul.f32 %v47_v8, %v47_v8 }
  0x34   :  { %v50_v12 = vmul.f32 %v49_v10, %v48_v9 }
  0x36   :  { %v52_v13 = vmul.f32 %v51_v11, %v50_v12 }
  0x38   :  { %v53_v14 = vadd.f32 %v52_v13, %v40_v7 }
  0x3a   :  { %54 = vst [vmem:[#allocation7] sm:$0xf] %v53_v14 }
  0x3b   :  { %129 = shalt.err (!%p126_p6)
}
  0x3c   :  { %s130_s13 = scalar_lea.hbm %s211_s3, 64 }
  0x3d   :  { %p131_p7 = scmp.ne.s32.totalorder %s211_s3, %s130_s13  ;;  %p134_p8 = scmp.lt.u32.totalorder %s130_s13, %s211_s3 }
  0x3f   :  { %p136_p9 = pnand %p134_p8, %p131_p7 }
  0x41   :  { %139 = shalt.err (!%p136_p9)
}
  0x42   :  { %64 = dma.vmem_to_hbm [thread:$0]  %s62_s10, 64, %s211_s3, [#allocation4]  }
  0x43   :  { %144 = dma.done.wait [#allocation4], 64  }
  0x44   :  { %145 = vsyncadd [#allocation4], 4294967232 }
  0x45   :  { %68 = vsyncpa [#allocation3], 1 }
  0x46   :  { %69 = vsyncpa [#allocation6], 1 }
  0x47   :  { %70 = vsyncpa [#allocation4], 1 }

</bundles_post_ra>
